<compile_context>
chip_gen: v5e
topology: v5e:2x2
jax: 0.10.0
libtpu: 0.0.40
codegen_flags: <defaults>
</compile_context>

<pallas_src>
import functools

import jax
import jax.numpy as jnp
from jax.experimental import pallas as pl
from jax.experimental.pallas import tpu as pltpu


# ----------------------------------------------------------------------------
# Pallas kernel: per-(batch, chunk, spatial-tile) softmax + one-hot + sums.
# ----------------------------------------------------------------------------
def _dice_sums_kernel(*refs, C, S, tile_s, tiles_per_chunk, need_tail, has_mask):
    if has_mask:
        (logits_ref, target_ref, mask_ref,
         inter_ref, union_ref, inter_acc, union_acc) = refs
    else:
        (logits_ref, target_ref,
         inter_ref, union_ref, inter_acc, union_acc) = refs
        mask_ref = None

    s = pl.program_id(2)

    @pl.when(s == 0)
    def _():
        inter_acc[...] = jnp.zeros_like(inter_acc)
        union_acc[...] = jnp.zeros_like(union_acc)

    x = logits_ref[0].astype(jnp.float32)             # (C, TS)
    t = target_ref[0].astype(jnp.int32)               # (1, TS)

    # Softmax over the channel (sublane) axis.
    m = jnp.max(x, axis=0, keepdims=True)             # (1, TS)
    e = jnp.exp(x - m)                                # (C, TS)
    inv = pl.reciprocal(jnp.sum(e, axis=0, keepdims=True), approx=False)
    p = e * inv                                       # (C, TS)

    ch = jax.lax.broadcasted_iota(jnp.int32, (C, tile_s), 0)
    onehot = ch == t                                  # bool (C, TS)

    msk = mask_ref[0].astype(jnp.float32) if has_mask else None   # (1, TS)

    if need_tail:
        # Mask out lanes past the end of the (unpadded) spatial axis. Use
        # selects (not multiplies) so garbage data in the overhanging block
        # can never produce NaNs that leak into the sums.
        c = pl.program_id(1)
        start = (c * tiles_per_chunk + s) * tile_s
        pos = start + jax.lax.broadcasted_iota(jnp.int32, (1, tile_s), 1)
        valid = pos < S                               # (1, TS)
        if has_mask:
            msk = jnp.where(valid, msk, 0.0)
            pm = jnp.where(valid, p * msk, 0.0)       # p * mask, zero on tail
            oh_f = jnp.where(onehot, msk, 0.0)        # onehot * mask
        else:
            pm = jnp.where(valid, p, 0.0)
            oh_f = jnp.where(jnp.logical_and(onehot, valid), 1.0, 0.0)
    else:
        if has_mask:
            pm = p * msk
            oh_f = jnp.where(onehot, msk, 0.0)
        else:
            pm = p
            oh_f = onehot.astype(jnp.float32)

    # inter = sum(p * onehot * mask) ; union = sum(p * mask) + sum(onehot * mask)
    inter_acc[...] += jnp.sum(jnp.where(onehot, pm, 0.0), axis=1, keepdims=True)
    union_acc[...] += jnp.sum(pm + oh_f, axis=1, keepdims=True)

    @pl.when(s == pl.num_programs(2) - 1)
    def _():
        inter_ref[...] = inter_acc[...].reshape(1, 1, C, 1)
        union_ref[...] = union_acc[...].reshape(1, 1, C, 1)


# ----------------------------------------------------------------------------
# Tiling / driver
# ----------------------------------------------------------------------------
_MAX_TILE = 32768
_VMEM_TILE_BUDGET = 10 * 1024 * 1024   # conservative: fits v5e/v6e/v7x budgets


def _choose_tile_s(S, C, logits_bytes, target_bytes, mask_bytes):
    # Double-buffered input streams + ~6 f32 (C, tile_s) intermediates.
    per_lane = 2 * (C * logits_bytes + target_bytes + mask_bytes) + 6 * C * 4
    cap = (_VMEM_TILE_BUDGET // per_lane) // 128 * 128
    cap = max(512, min(_MAX_TILE, cap))
    if S <= cap:
        return S          # single full-extent tile (no 128-divisibility needed)
    return cap


def _dice_sums(logits_ncs, target_n1s, mask_n1s=None, *, tile_s=None):
    """logits_ncs (N,C,S); target_n1s (N,1,S) int; mask_n1s (N,1,S) or None.
    Returns (inter, union), each (N, C) float32."""
    N, C, S = logits_ncs.shape
    has_mask = mask_n1s is not None

    if tile_s is None:
        tile_s = _choose_tile_s(
            S, C, logits_ncs.dtype.itemsize, target_n1s.dtype.itemsize,
            mask_n1s.dtype.itemsize if has_mask else 0)
    tile_s = int(tile_s)
    assert tile_s == S or tile_s % 128 == 0, "tile_s must be 128-aligned or == S"

    n_tiles = pl.cdiv(S, tile_s)
    need_tail = (S % tile_s) != 0

    # With N == 1, expose a parallel chunk axis so both v7x TensorCores work.
    n_sub = 2 if (N == 1 and n_tiles >= 2 and n_tiles % 2 == 0) else 1
    tiles_per_chunk = n_tiles // n_sub

    kernel = functools.partial(
        _dice_sums_kernel, C=C, S=S, tile_s=tile_s,
        tiles_per_chunk=tiles_per_chunk, need_tail=need_tail, has_mask=has_mask)

    def spatial(c, s):
        return c * tiles_per_chunk + s

    in_specs = [
        pl.BlockSpec((1, C, tile_s), lambda n, c, s: (n, 0, spatial(c, s))),
        pl.BlockSpec((1, 1, tile_s), lambda n, c, s: (n, 0, spatial(c, s))),
    ]
    inputs = [logits_ncs, target_n1s]
    if has_mask:
        in_specs.append(
            pl.BlockSpec((1, 1, tile_s), lambda n, c, s: (n, 0, spatial(c, s))))
        inputs.append(mask_n1s)

    out_specs = [
        pl.BlockSpec((1, 1, C, 1), lambda n, c, s: (n, c, 0, 0)),
        pl.BlockSpec((1, 1, C, 1), lambda n, c, s: (n, c, 0, 0)),
    ]
    out_shape = (
        jax.ShapeDtypeStruct((N, n_sub, C, 1), jnp.float32),
        jax.ShapeDtypeStruct((N, n_sub, C, 1), jnp.float32),
    )

    grid_spec = pltpu.PrefetchScalarGridSpec(
        num_scalar_prefetch=0,
        grid=(N, n_sub, tiles_per_chunk),
        in_specs=in_specs,
        out_specs=out_specs,
        scratch_shapes=[pltpu.VMEM((C, 1), jnp.float32),
                        pltpu.VMEM((C, 1), jnp.float32)],
    )

    inter4, union4 = pl.pallas_call(
        kernel,
        out_shape=out_shape,
        grid_spec=grid_spec,
        compiler_params=pltpu.CompilerParams(
            dimension_semantics=("parallel", "parallel", "arbitrary"),
            vmem_limit_bytes=32 * 1024 * 1024,
        ),
    )(*inputs)

    inter = jnp.sum(inter4[..., 0], axis=1)    # (N, C)
    union = jnp.sum(union4[..., 0], axis=1)    # (N, C)
    return inter, union


# ----------------------------------------------------------------------------
# Module-equivalent wrapper (mask_DiceLoss.forward)
# ----------------------------------------------------------------------------
def mask_dice_loss(logits, target, mask=None, *, smooth=1e-5, tile_s=None):
    # logits: (N, C, H, W[, D]) float; target: (N, 1, H, W[, D]) integer labels
    N, C = logits.shape[0], logits.shape[1]
    S = 1
    for d in logits.shape[2:]:
        S *= d

    logits = logits.reshape(N, C, S)                 # native dtype; cast in-kernel
    if not jnp.issubdtype(target.dtype, jnp.integer):
        target = target.astype(jnp.int32)
    target = target.reshape(N, 1, S)

    if C == 1:
        # sigmoid(x) == softmax([0, x]) over channels, reproducing the
        # "sigmoid + cat([1-p, p])" branch of get_probability.
        logits = jnp.concatenate([jnp.zeros_like(logits), logits], axis=1)
        C = 2

    mask_n1s = None if mask is None else mask.reshape(N, 1, S)

    inter, union = _dice_sums(logits, target, mask_n1s, tile_s=tile_s)
    dice = (2.0 * inter + smooth) / (union + smooth)
    return 1.0 - jnp.mean(dice)


class MaskDiceLossPallas:
    def __init__(self, nclass, class_weights=None, smooth=1e-5):
        self.smooth = smooth
        if class_weights is None:
            self.class_weights = jnp.ones((1, nclass), dtype=jnp.float32)
        else:
            self.class_weights = jnp.asarray(class_weights, dtype=jnp.float32)
        # NOTE: class_weights are never used in mask_DiceLoss.forward; kept for fidelity.

    def __call__(self, logits, target, mask=None):
        return mask_dice_loss(logits, target, mask, smooth=self.smooth)


# ----------------------------------------------------------------------------
# Pure-JAX reference (sanity check only)
# ----------------------------------------------------------------------------
def _reference(logits, target, smooth=1e-5, mask=None):
    N, C = logits.shape[0], logits.shape[1]
    S = 1
    for d in logits.shape[2:]:
        S *= d
    lg = logits.reshape(N, C, S).astype(jnp.float32)
    tg = target.reshape(N, 1, S).astype(jnp.int32)
    if C > 1:
        pred = jax.nn.softmax(lg, axis=1)
    else:
        p1 = jax.nn.sigmoid(lg)
        pred = jnp.concatenate([1.0 - p1, p1], axis=1)
        C = 2
    onehot = (jnp.arange(C)[None, :, None] == tg).astype(jnp.float32)
    msk = (jnp.ones((N, 1, S), jnp.float32) if mask is None
           else mask.reshape(N, 1, S).astype(jnp.float32))
    inter = jnp.sum(pred * onehot * msk, axis=2)
    union = jnp.sum((pred + onehot) * msk, axis=2)
    dice = (2.0 * inter + smooth) / (union + smooth)
    return 1.0 - jnp.mean(dice)


if __name__ == "__main__":
    key = jax.random.PRNGKey(0)
    k1, k2, k3, k4, k5 = jax.random.split(key, 5)

    # Case 1: canonical small shape, mask=None (single full-S tile).
    N, C, H, W = 2, 4, 16, 16
    logits = jax.random.normal(k1, (N, C, H, W), dtype=jnp.float32)
    target = jax.random.randint(k2, (N, 1, H, W), 0, C, dtype=jnp.int32)
    loss_fn = MaskDiceLossPallas(nclass=C)
    loss = loss_fn(logits, target)
    jax.block_until_ready(loss)
    ref = _reference(logits, target)
    assert jnp.allclose(loss, ref, atol=1e-5, rtol=1e-5), (loss, ref)

    # Case 2: explicit float mask path.
    mask = (jax.random.uniform(k3, (N, 1, H, W)) > 0.5).astype(jnp.float32)
    loss_m = loss_fn(logits, target, mask)
    jax.block_until_ready(loss_m)
    ref_m = _reference(logits, target, mask=mask)
    assert jnp.allclose(loss_m, ref_m, atol=1e-5, rtol=1e-5), (loss_m, ref_m)

    # Case 3: multi-tile + ragged spatial tail (forced small tile, no pad).
    N3, C3, H3, W3 = 1, 3, 16, 20            # S = 320 -> tiles of 128 + tail 64
    lg3 = jax.random.normal(k4, (N3, C3, H3, W3), dtype=jnp.float32)
    tg3 = jax.random.randint(k5, (N3, 1, H3, W3), 0, C3, dtype=jnp.int32)
    loss3 = mask_dice_loss(lg3, tg3, tile_s=128)
    jax.block_until_ready(loss3)
    ref3 = _reference(lg3, tg3)
    assert jnp.allclose(loss3, ref3, atol=1e-5, rtol=1e-5), (loss3, ref3)

    # Case 4: N=1 chunked (megacore) path with a mask, even tile count.
    N4, C4, H4, W4 = 1, 4, 16, 32            # S = 512 -> 4 tiles, 2 chunks
    lg4 = jax.random.normal(k1, (N4, C4, H4, W4), dtype=jnp.float32)
    tg4 = jax.random.randint(k2, (N4, 1, H4, W4), 0, C4, dtype=jnp.int32)
    mk4 = (jax.random.uniform(k3, (N4, 1, H4, W4)) > 0.3).astype(jnp.float32)
    loss4 = mask_dice_loss(lg4, tg4, mk4, tile_s=128)
    jax.block_until_ready(loss4)
    ref4 = _reference(lg4, tg4, mask=mk4)
    assert jnp.allclose(loss4, ref4, atol=1e-5, rtol=1e-5), (loss4, ref4)

    # Case 5: single-channel (sigmoid) branch.
    N5, C5, H5, W5 = 2, 1, 16, 16
    lg5 = jax.random.normal(k4, (N5, C5, H5, W5), dtype=jnp.float32)
    tg5 = jax.random.randint(k5, (N5, 1, H5, W5), 0, 2, dtype=jnp.int32)
    loss5 = mask_dice_loss(lg5, tg5)
    jax.block_until_ready(loss5)
    ref5 = _reference(lg5, tg5)
    assert jnp.allclose(loss5, ref5, atol=1e-5, rtol=1e-5), (loss5, ref5)

    print("KERNEL_OK")
</pallas_src>

<mosaic_0001>
module attributes {stable_mosaic.version = 11 : i64} {
  func.func @_dice_sums_kernel(%arg0: i32, %arg1: i32, %arg2: i32, %arg3: memref<1x4x256xf32, #tpu.memory_space<vmem>>, %arg4: memref<1x1x256xi32, #tpu.memory_space<vmem>>, %arg5: memref<1x1x4x1xf32, #tpu.memory_space<vmem>>, %arg6: memref<1x1x4x1xf32, #tpu.memory_space<vmem>>, %arg7: memref<4x1xf32, #tpu.memory_space<vmem>>, %arg8: memref<4x1xf32, #tpu.memory_space<vmem>>) attributes {dimension_semantics = [#tpu.dimension_semantics<parallel>, #tpu.dimension_semantics<parallel>, #tpu.dimension_semantics<arbitrary>], iteration_bounds = array<i64: 2, 1, 1>, scalar_prefetch = 0 : i64, scratch_operands = 2 : i64, tpu.core_type = #tpu.core_type<tc>, window_params = [{transform_indices = @transform_0, window_bounds = array<i64: 1, 4, 256>}, {transform_indices = @transform_1, window_bounds = array<i64: 1, 1, 256>}, {transform_indices = @transform_2, window_bounds = array<i64: 1, 1, 4, 1>}, {transform_indices = @transform_3, window_bounds = array<i64: 1, 1, 4, 1>}]} {
    %c0_i32 = arith.constant 0 : i32
    %0 = arith.cmpi eq, %arg2, %c0_i32 : i32
    %1 = arith.extui %0 : i1 to i32
    %c0_i32_0 = arith.constant 0 : i32
    %2 = arith.cmpi ne, %1, %c0_i32_0 : i32
    scf.if %2 {
      %cst_20 = arith.constant 0.000000e+00 : f32
      %38 = vector.broadcast %cst_20 : f32 to vector<4x1xf32>
      %c0_21 = arith.constant 0 : index
      %c0_22 = arith.constant 0 : index
      %39 = vector.load %arg7[%c0_21, %c0_22] : memref<4x1xf32, #tpu.memory_space<vmem>>, vector<4x1xf32>
      tpu.vector_store %arg7[%c0_21, %c0_22], %38 {strides = array<i32>} : memref<4x1xf32, #tpu.memory_space<vmem>>, vector<4x1xf32>,
      %cst_23 = arith.constant 0.000000e+00 : f32
      %40 = vector.broadcast %cst_23 : f32 to vector<4x1xf32>
      %c0_24 = arith.constant 0 : index
      %c0_25 = arith.constant 0 : index
      %41 = vector.load %arg8[%c0_24, %c0_25] : memref<4x1xf32, #tpu.memory_space<vmem>>, vector<4x1xf32>
      tpu.vector_store %arg8[%c0_24, %c0_25], %40 {strides = array<i32>} : memref<4x1xf32, #tpu.memory_space<vmem>>, vector<4x1xf32>,
    } else {
    }
    %c0 = arith.constant 0 : index
    %c0_1 = arith.constant 0 : index
    %c0_2 = arith.constant 0 : index
    %3 = vector.load %arg3[%c0, %c0_1, %c0_2] : memref<1x4x256xf32, #tpu.memory_space<vmem>>, vector<1x4x256xf32>
    %4 = vector.shape_cast %3 : vector<1x4x256xf32> to vector<4x256xf32>
    %c0_3 = arith.constant 0 : index
    %c0_4 = arith.constant 0 : index
    %c0_5 = arith.constant 0 : index
    %5 = vector.load %arg4[%c0_3, %c0_4, %c0_5] : memref<1x1x256xi32, #tpu.memory_space<vmem>>, vector<1x1x256xi32>
    %6 = vector.shape_cast %5 : vector<1x1x256xi32> to vector<1x256xi32>
    %cst = arith.constant dense<0xFF800000> : vector<256xf32>
    %7 = vector.multi_reduction <maximumf>, %4, %cst [0] : vector<4x256xf32> to vector<256xf32>
    %8 = vector.shape_cast %7 : vector<256xf32> to vector<1x256xf32>
    %9 = vector.broadcast %8 : vector<1x256xf32> to vector<4x256xf32>
    %10 = arith.subf %4, %9 : vector<4x256xf32>
    %11 = math.exp %10 : vector<4x256xf32>
    %cst_6 = arith.constant dense<0.000000e+00> : vector<256xf32>
    %12 = vector.multi_reduction <add>, %11, %cst_6 [0] : vector<4x256xf32> to vector<256xf32>
    %13 = vector.shape_cast %12 : vector<256xf32> to vector<1x256xf32>
    %14 = tpu.reciprocal %13 : vector<1x256xf32> -> vector<1x256xf32>
    %15 = vector.broadcast %14 : vector<1x256xf32> to vector<4x256xf32>
    %16 = arith.mulf %11, %15 : vector<4x256xf32>
    %17 = tpu.iota {dimensions = array<i32: 0>} : vector<4x256xi32>
    %18 = vector.broadcast %6 : vector<1x256xi32> to vector<4x256xi32>
    %19 = arith.cmpi eq, %17, %18 : vector<4x256xi32>
    %20 = arith.extui %19 : vector<4x256xi1> to vector<4x256xi32>
    %21 = arith.sitofp %20 : vector<4x256xi32> to vector<4x256xf32>
    %c0_7 = arith.constant 0 : index
    %c0_8 = arith.constant 0 : index
    %22 = vector.load %arg7[%c0_7, %c0_8] : memref<4x1xf32, #tpu.memory_space<vmem>>, vector<4x1xf32>
    %cst_9 = arith.constant 0.000000e+00 : f32
    %23 = vector.broadcast %cst_9 : f32 to vector<4x256xf32>
    %24 = arith.select %19, %16, %23 : vector<4x256xi1>, vector<4x256xf32>
    %cst_10 = arith.constant dense<0.000000e+00> : vector<4xf32>
    %25 = vector.multi_reduction <add>, %24, %cst_10 [1] : vector<4x256xf32> to vector<4xf32>
    %26 = vector.shape_cast %25 : vector<4xf32> to vector<4x1xf32>
    %27 = arith.addf %22, %26 : vector<4x1xf32>
    %c0_11 = arith.constant 0 : index
    %c0_12 = arith.constant 0 : index
    %28 = vector.load %arg7[%c0_11, %c0_12] : memref<4x1xf32, #tpu.memory_space<vmem>>, vector<4x1xf32>
    tpu.vector_store %arg7[%c0_11, %c0_12], %27 {strides = array<i32>} : memref<4x1xf32, #tpu.memory_space<vmem>>, vector<4x1xf32>,
    %c0_13 = arith.constant 0 : index
    %c0_14 = arith.constant 0 : index
    %29 = vector.load %arg8[%c0_13, %c0_14] : memref<4x1xf32, #tpu.memory_space<vmem>>, vector<4x1xf32>
    %30 = arith.addf %16, %21 : vector<4x256xf32>
    %cst_15 = arith.constant dense<0.000000e+00> : vector<4xf32>
    %31 = vector.multi_reduction <add>, %30, %cst_15 [1] : vector<4x256xf32> to vector<4xf32>
    %32 = vector.shape_cast %31 : vector<4xf32> to vector<4x1xf32>
    %33 = arith.addf %29, %32 : vector<4x1xf32>
    %c0_16 = arith.constant 0 : index
    %c0_17 = arith.constant 0 : index
    %34 = vector.load %arg8[%c0_16, %c0_17] : memref<4x1xf32, #tpu.memory_space<vmem>>, vector<4x1xf32>
    tpu.vector_store %arg8[%c0_16, %c0_17], %33 {strides = array<i32>} : memref<4x1xf32, #tpu.memory_space<vmem>>, vector<4x1xf32>,
    %c0_i32_18 = arith.constant 0 : i32
    %35 = arith.cmpi eq, %arg2, %c0_i32_18 : i32
    %36 = arith.extui %35 : i1 to i32
    %c0_i32_19 = arith.constant 0 : i32
    %37 = arith.cmpi ne, %36, %c0_i32_19 : i32
    scf.if %37 {
      %c0_20 = arith.constant 0 : index
      %c0_21 = arith.constant 0 : index
      %38 = vector.load %arg7[%c0_20, %c0_21] : memref<4x1xf32, #tpu.memory_space<vmem>>, vector<4x1xf32>
      %39 = vector.shape_cast %38 : vector<4x1xf32> to vector<1x1x4x1xf32>
      %c0_22 = arith.constant 0 : index
      %c0_23 = arith.constant 0 : index
      %c0_24 = arith.constant 0 : index
      %c0_25 = arith.constant 0 : index
      %40 = vector.load %arg5[%c0_22, %c0_23, %c0_24, %c0_25] : memref<1x1x4x1xf32, #tpu.memory_space<vmem>>, vector<1x1x4x1xf32>
      tpu.vector_store %arg5[%c0_22, %c0_23, %c0_24, %c0_25], %39 {strides = array<i32>} : memref<1x1x4x1xf32, #tpu.memory_space<vmem>>, vector<1x1x4x1xf32>,
      %c0_26 = arith.constant 0 : index
      %c0_27 = arith.constant 0 : index
      %41 = vector.load %arg8[%c0_26, %c0_27] : memref<4x1xf32, #tpu.memory_space<vmem>>, vector<4x1xf32>
      %42 = vector.shape_cast %41 : vector<4x1xf32> to vector<1x1x4x1xf32>
      %c0_28 = arith.constant 0 : index
      %c0_29 = arith.constant 0 : index
      %c0_30 = arith.constant 0 : index
      %c0_31 = arith.constant 0 : index
      %43 = vector.load %arg6[%c0_28, %c0_29, %c0_30, %c0_31] : memref<1x1x4x1xf32, #tpu.memory_space<vmem>>, vector<1x1x4x1xf32>
      tpu.vector_store %arg6[%c0_28, %c0_29, %c0_30, %c0_31], %42 {strides = array<i32>} : memref<1x1x4x1xf32, #tpu.memory_space<vmem>>, vector<1x1x4x1xf32>,
    } else {
    }
    return
  }
  func.func @transform_0(%arg0: i32, %arg1: i32, %arg2: i32) -> (i32, i32, i32) {
    %c1_i32 = arith.constant 1 : i32
    %0 = arith.muli %arg1, %c1_i32 : i32
    %1 = arith.addi %0, %arg2 : i32
    %c0_i32 = arith.constant 0 : i32
    %c0_i32_0 = arith.constant 0 : i32
    return %arg0, %c0_i32, %1 : i32, i32, i32
  }
  func.func @transform_1(%arg0: i32, %arg1: i32, %arg2: i32) -> (i32, i32, i32) {
    %c1_i32 = arith.constant 1 : i32
    %0 = arith.muli %arg1, %c1_i32 : i32
    %1 = arith.addi %0, %arg2 : i32
    %c0_i32 = arith.constant 0 : i32
    %c0_i32_0 = arith.constant 0 : i32
    return %arg0, %c0_i32, %1 : i32, i32, i32
  }
  func.func @transform_2(%arg0: i32, %arg1: i32, %arg2: i32) -> (i32, i32, i32, i32) {
    %c0_i32 = arith.constant 0 : i32
    %c0_i32_0 = arith.constant 0 : i32
    %c0_i32_1 = arith.constant 0 : i32
    return %arg0, %arg1, %c0_i32, %c0_i32_0 : i32, i32, i32, i32
  }
  func.func @transform_3(%arg0: i32, %arg1: i32, %arg2: i32) -> (i32, i32, i32, i32) {
    %c0_i32 = arith.constant 0 : i32
    %c0_i32_0 = arith.constant 0 : i32
    %c0_i32_1 = arith.constant 0 : i32
    return %arg0, %arg1, %c0_i32, %c0_i32_0 : i32, i32, i32, i32
  }
}

</mosaic_0001>

<bundles_post_ra>
// kernel: tpu_custom_call.1
= control target key start
LH: loop header
LB: loop body
LE: loop exit
PB: predicated region body
PF: predicated region fallthrough
CT: control target
= control target key end

     0   :  { %9 = vsyncpa [#allocation5], 0  ;;  %s957_s0 = inlined_call_operand.hbm [shape: f32[2,4,256], index: 0, kind: input, shape index: {}]   ;;  %s958_s1 = inlined_call_operand.hbm [shape: s32[2,1,256], index: 1, kind: input, shape index: {}]   ;;  %s959_s2 = inlined_call_operand.vmem [shape: f32[2,1,4,1], index: 2, kind: output, shape index: {0}]   ;;  %s960_s3 = inlined_call_operand.vmem [shape: f32[2,1,4,1], index: 3, kind: output, shape index: {1}]  }
   0x1   :  { %11 = vsyncpa [#allocation5 + $0x1], 0 }
   0x2   :  { %12 = vsyncpa [#allocation7], 0 }
   0x3   :  { %14 = vsyncpa [#allocation7 + $0x1], 0  ;;  %s818_s12 = smov 0   ;;  %s820_s13 = smov 0  }
   0x4   :  { %s822_s14 = smov 0   ;;  %s824_s15 = smov 0  }
   0x5   :  { %s826_s16 = smov 0   ;;  %s828_s17 = smov 0  }
   0x6 LB: > { %s595_s18 = sadd.s32 4294967295, %s795_s17   ;;  %s39_s19 = sadd.s32 1, %s791_s16  ;;  %s795_s17 = sphi %s828_s17, %s20_s17   ;;  %s791_s16 = sphi %s826_s16, %s970_s16   ;;  %s787_s15 = sphi %s824_s15, %s969_s15   ;;  %s783_s14 = sphi %s822_s14, %s968_s14   ;;  %s779_s13 = sphi %s820_s13, %s967_s13   ;;  %s775_s12 = sphi %s818_s12, %s966_s12  }
   0x7   : > { %p41_p0 = scmp.ge.s32.totalorder %s39_s19, 2  ;;  %s50_s20 = sadd.s32 1, %s783_s14 }
   0x8   : > { %p57_p1 = scmp.ne.s32.totalorder %s783_s14, %s779_s13  ;;  %p58_p2 = scmp.eq.s32.totalorder %s795_s17, 0 }
   0x9   : > { %s972_s19 = smov (%p41_p0, %s39_s19), 0  ;;  %p63_p4 = scmp.ne.s32.totalorder %s779_s13, %s775_s12 }
   0xa   : > { %p854_p3 = por %p58_p2, %p57_p1  ;;  %s45_s22 = ssub.s32 %s791_s16, %s972_s19 }
   0xb   : > { %p64_p5 = scmp.eq.s32.totalorder %s595_s18, 0  ;;  %p48_p6 = scmp.eq.s32.totalorder %s45_s22, 0 }
   0xc   : > { %p625_p8 = scmp.lt.s32.totalorder %s795_s17, 2  ;;  %s173_s25 = sand.u32 1, %s783_s14  }
   0xd   : > { %p861_p7 = por %p64_p5, %p63_p4  ;;  %s613_s26 = sshll.u32 %s791_s16, 3 }
   0xe   : > { %s867_s24 = scalar_select %p48_p6, %s783_s14, %s50_s20  }
   0xf   : > { %s599_s27 = sshll.u32 %s173_s25, 3  ;;  %s185_s30 = scalar_lea.hbm %s957_s0, %s613_s26 }
  0x10   : > { %s187_s4 = sshll.u32 %s185_s30, 4  ;;  %s177_s5 = scalar_lea.vmem [#allocation4], %s599_s27  ;;  %s188_s4 = int_to_ptr.hbm [resolvable:$true] %s187_s4 }
  0x11   : > { %s189_s6 = sshll.u32 %s177_s5, 4  ;;  %p876_p9 = pnand %p625_p8, %p854_p3  ;;  %s190_s6 = int_to_ptr.vmem [resolvable:$true] %s189_s6 }
  0x12   : > { %p604_p10 = scmp.ge.s32.totalorder %s795_s17, 1  ;;  %p216_p11 = scmp.lt.s32.totalorder %s795_s17, 3 }
  0x13   : > { %s602_s8 = sshll.u32 %s173_s25, 1  ;;  %s174_s9 = scalar_lea.sflag [#allocation5], %s173_s25 }
  0x14   : > { %621 = dma.hbm_to_vmem [thread:$0]  (!%p876_p9), %s188_s4, 128, %s190_s6, %s174_s9  }
  0x15   : > { %p217_p12 = pnand %p604_p10, %p216_p11  ;;  %s603_s10 = sshll.u32 %s791_s16, 1 }
  0x16   : > { %s200_s11 = scalar_lea.vmem [#allocation6], %s602_s8  ;;  %s207_s21 = scalar_lea.hbm %s958_s1, %s603_s10 }
  0x17   : > { %s211_s12 = sshll.u32 %s200_s11, 4  ;;  %s209_s22 = sshll.u32 %s207_s21, 4  ;;  %s212_s12 = int_to_ptr.vmem [resolvable:$true] %s211_s12  ;;  %s210_s22 = int_to_ptr.hbm [resolvable:$true] %s209_s22 }
  0x18   : > { %s197_s26 = scalar_lea.sflag [#allocation7], %s173_s25  ;;  %220 = sbr.rel (%p217_p12) target bundleno = 263 (0x107), region = 28 }
  0x19   : > { %624 = dma.hbm_to_vmem [thread:$0]  (!%p876_p9), %s210_s22, 32, %s212_s12, %s197_s26  }
  0x1a   : > { %s222_s27 = sand.u32 (!%p217_p12), 1, %s779_s13  }
  0x1b   : > { %s605_s28 = sshll.u32 (!%p217_p12), %s222_s27, 3  ;;  %s223_s29 = scalar_lea.sflag (!%p217_p12), [#allocation5], %s222_s27 }
  0x1c   : > { %s226_s30 = scalar_lea.vmem (!%p217_p12), [#allocation4], %s605_s28 }
  0x1d   : > { %766 = dma.done.wait (%p861_p7), %s223_s29, 128  }
  0x1e   : > { %768 = vsyncadd (%p861_p7), %s223_s29, 4294967168  ;;  %s606_s4 = sshll.u32 %s222_s27, 1  ;;  %s233_s5 = scalar_lea.sflag [#allocation7], %s222_s27 }
  0x1f   : > { %s895_s6 = scalar_lea.vmem [#allocation6], %s606_s4 }
  0x20   : > { %770 = dma.done.wait (%p861_p7), %s233_s5, 32  }
  0x21   : > { %772 = vsyncadd (%p861_p7), %s233_s5, 4294967264  ;;  %vm296_vm0 = vcmask 3072   ;;  %v797_v0 = vmov 0.0   ;;  %v299_v1 = vld [vmem:[%s226_s30] sm:$0xff]  ;;  %vm307_vm1 = vcmask 1043456   ;;  %v384_v40 = vlaneseq  ;;  %p278_p13 = scmp.lt.s32.totalorder %s787_s15, 1 }
  0x22   : > { %297 = vst.msk [vmem:[#allocation2] sm:$0xf] %vm296_vm0, %v797_v0  ;;  %v300_v39 = vld [vmem:[%s895_s6] sm:$0x3] }
  0x23   : > { %298 = vst.msk [vmem:[#allocation3] sm:$0xf] %vm296_vm0, %v797_v0  ;;  %v387_v44 = vperm.slane %v300_v39, 1  ;;  %v385_v47 = vshrl.u32 %v384_v40, 7  ;;  %v386_v58 = vperm.slane %v300_v39, 0  ;;  %s974_s15 = smov (!%p278_p13, %s787_s15), 1 }
  0x24   : > { %302 = vst [vmem:[#allocation1] ss:$2 sm:$0xff] %v299_v1  ;;  %s607_s23 = sshll.u32 %s974_s15, 2 }
  0x25   : > { %vm911_vm10 = vcmp.eq.s32.totalorder %v385_v47, %v387_v44  ;;  %vm388_vm11 = vcmp.eq.s32.totalorder %v385_v47, %v386_v58  ;;  %s284_s8 = scalar_lea.vmem %s959_s2, %s607_s23  ;;  %s291_s11 = scalar_lea.vmem %s960_s3, %s607_s23 }
  0x2b   : > { %v303_v2 = vld.sshfl [vmem:[#allocation1] sm:$0xff pattern:$0x75316420]  ;;  %v304_v3 = vld.sshfl [vmem:[#allocation1 + $0x8] sm:$0xff pattern:$0x75316420] }
  0x2c   : > { %v308_v4 = vsel %vm307_vm1, %v303_v2, -inf  ;;  %v315_v5 = vsel %vm307_vm1, %v304_v3, -inf  ;;  %v610_v2 = vsel %vm911_vm10, 1.0, %v797_v0 }
  0x2d   : > { %v309_v6 = vrot.slane %v308_v4, 4  ;;  %v316_v7 = vrot.slane %v315_v5, 4 }
  0x2f   : > { %v310_v8 = vmax.f32 %v308_v4, %v309_v6  ;;  %v317_v9 = vmax.f32 %v315_v5, %v316_v7  ;;  %v414_v5 = vrot.slane %v610_v2, 4  ;;  %v609_v7 = vsel %vm388_vm11, 1.0, %v797_v0 }
  0x31   : > { %v311_v10 = vrot.slane %v310_v8, 2  ;;  %v318_v11 = vrot.slane %v317_v9, 2 }
  0x33   : > { %v312_v12 = vmax.f32 %v310_v8, %v311_v10  ;;  %v319_v13 = vmax.f32 %v317_v9, %v318_v11  ;;  %v415_v8 = vsel %vm307_vm1, %v609_v7, %v414_v5 }
  0x35   : > { %v313_v14 = vrot.slane %v312_v12, 1  ;;  %v320_v15 = vrot.slane %v319_v13, 1 }
  0x37   : > { %v314_v16 = vmax.f32 %v312_v12, %v313_v14  ;;  %v321_v17 = vmax.f32 %v319_v13, %v320_v15 }
  0x39   : > { %v324_v18 = vrot.slane %v321_v17, 4 }
  0x3b   : > { %v325_v19 = vsel %vm307_vm1, %v314_v16, %v324_v18 }
  0x3c   : > { %v327_v20 = vsub.f32 %v299_v1, %v325_v19 }
  0x3e   : > { %v328_v21 = vmul.f32 1.442695, %v327_v20 }
  0x40   : > { %675 = vpow2.f32 %v328_v21  ;;  %v394_v21 = vld [vmem:[#allocation2] sm:$0xf] }
  0x46   : > { %v676_v22 = vpop.eup %675 }
  0x47   : > { %331 = vst [vmem:[#allocation1] ss:$2 sm:$0xff] %v676_v22 }
  0x4e   : > { %v332_v23 = vld.sshfl [vmem:[#allocation1] sm:$0xff pattern:$0x75316420]  ;;  %v333_v24 = vld.sshfl [vmem:[#allocation1 + $0x8] sm:$0xff pattern:$0x75316420] }
  0x4f   : > { %v336_v25 = vsel %vm307_vm1, %v332_v23, 0.0  ;;  %v343_v26 = vsel %vm307_vm1, %v333_v24, 0.0  ;;  %v411_v24 = vld [vmem:[#allocation3] sm:$0xf] }
  0x50   : > { %v337_v27 = vrot.slane %v336_v25, 4  ;;  %v344_v28 = vrot.slane %v343_v26, 4 }
  0x52   : > { %v338_v29 = vadd.f32 %v337_v27, %v336_v25  ;;  %v345_v30 = vadd.f32 %v344_v28, %v343_v26 }
  0x54   : > { %v339_v31 = vrot.slane %v338_v29, 2  ;;  %v346_v32 = vrot.slane %v345_v30, 2 }
  0x56   : > { %v340_v33 = vadd.f32 %v339_v31, %v338_v29  ;;  %v347_v34 = vadd.f32 %v346_v32, %v345_v30 }
  0x58   : > { %v341_v35 = vrot.slane %v340_v33, 1  ;;  %v348_v36 = vrot.slane %v347_v34, 1 }
  0x5a   : > { %v342_v37 = vadd.f32 %v341_v35, %v340_v33  ;;  %v349_v38 = vadd.f32 %v348_v36, %v347_v34 }
  0x5c   : > { %677 = vrcp.f32 %v342_v37  ;;  %vm355_vm2 = vweird.f32 %v342_v37  ;;  %v359_v45 = vand.u32 2147483647, %v342_v37  ;;  %v361_v49 = vand.u32 2147483648, %v342_v37 }
  0x5d   : > { %679 = vrcp.f32 %v349_v38  ;;  %v375_v50 = vand.u32 2147483648, %v349_v38  ;;  %vm369_vm4 = vweird.f32 %v349_v38  ;;  %v373_v52 = vand.u32 2147483647, %v349_v38 }
  0x5e   : > { %v362_v56 = vor.u32 1.1754944e-38, %v361_v49  ;;  %vm360_vm8 = vcmp.eq.f32.partialorder %v359_v45, 8.507059e+37 }
  0x5f   : > { %v376_v57 = vor.u32 1.1754944e-38, %v375_v50  ;;  %vm374_vm9 = vcmp.eq.f32.partialorder %v373_v52, 8.507059e+37 }
  0x62   : > { %v678_v41 = vpop.eup %677 }
  0x63   : > { %v680_v42 = vpop.eup %679  ;;  %v351_v43 = vmul.f32 %v678_v41, %v342_v37  ;;  %vm356_vm3 = vweird.f32 %v678_v41 }
  0x64   : > { %v365_v46 = vmul.f32 %v680_v42, %v349_v38  ;;  %vm370_vm5 = vweird.f32 %v680_v42  ;;  %vm357_vm6 = vmor %vm355_vm2, %vm356_vm3 }
  0x65   : > { %v352_v48 = vsub.f32 1.0, %v351_v43  ;;  %vm371_vm7 = vmor %vm369_vm4, %vm370_vm5 }
  0x66   : > { %v366_v51 = vsub.f32 1.0, %v365_v46 }
  0x67   : > { %v353_v53 = vmul.f32 %v678_v41, %v352_v48 }
  0x68   : > { %v367_v54 = vmul.f32 %v680_v42, %v366_v51 }
  0x69   : > { %v354_v55 = vadd.f32 %v678_v41, %v353_v53 }
  0x6a   : > { %v368_v59 = vadd.f32 %v680_v42, %v367_v54 }
  0x6b   : > { %v358_v61 = vsel %vm357_vm6, %v678_v41, %v354_v55 }
  0x6c   : > { %v372_v62 = vsel %vm371_vm7, %v680_v42, %v368_v59  ;;  %v363_v63 = vsel %vm360_vm8, %v362_v56, %v358_v61 }
  0x6d   : > { %v377_v1 = vsel %vm374_vm9, %v376_v57, %v372_v62 }
  0x6e   : > { %v380_v3 = vrot.slane %v377_v1, 4 }
  0x70   : > { %v381_v4 = vsel %vm307_vm1, %v363_v63, %v380_v3 }
  0x71   : > { %v383_v6 = vmul.f32 %v676_v22, %v381_v4 }
  0x73   : > { %396 = vst [vmem:[#allocation1] ss:$2 sm:$0xff] %v383_v6  ;;  %v417_v9 = vadd.f32 %v415_v8, %v383_v6 }
  0x7a   : > { %v397_v10 = vld.sshfl [vmem:[#allocation1] sm:$0xff pattern:$0x75316420]  ;;  %v398_v11 = vld.sshfl [vmem:[#allocation1 + $0x8] sm:$0xff pattern:$0x75316420] }
  0x7b   : > { %v401_v12 = vsel %vm388_vm11, %v397_v10, 0.0  ;;  %v402_v13 = vsel %vm911_vm10, %v398_v11, 0.0  ;;  %419 = vst [vmem:[#allocation1] ss:$2 sm:$0xff] %v417_v9 }
  0x7c   : > { %v403_v14 = vsel %vm307_vm1, %v401_v12, 0.0  ;;  %v404_v15 = vsel %vm307_vm1, %v402_v13, 0.0 }
  0x7d   : > { %v405_v16 = vadd.f32 %v404_v15, %v403_v14 }
  0x7f   : > { %406 = vadd.xlane.f32.xlu0 %v405_v16 }
  0x82   : > { %v420_v0 = vld.sshfl [vmem:[#allocation1] sm:$0xff pattern:$0x75316420]  ;;  %v421_v17 = vld.sshfl [vmem:[#allocation1 + $0x8] sm:$0xff pattern:$0x75316420] }
  0x83   : > { %v424_v18 = vsel %vm307_vm1, %v420_v0, 0.0  ;;  %v425_v19 = vsel %vm307_vm1, %v421_v17, 0.0 }
  0x84   : > { %v426_v20 = vadd.f32 %v425_v19, %v424_v18 }
  0x87   : > { %427 = vadd.xlane.f32.xlu0 %v426_v20 }
  0xf2   : > { %v407_v22 = vpop.xlane.xlu0 %406 }
  0xf3   : > { %v408_v23 = vadd.f32 %v407_v22, %v394_v21 }
  0xf5   : > { %410 = vst.msk [vmem:[#allocation2] sm:$0xf] %vm296_vm0, %v408_v23 }
  0xfa   : > { %v428_v25 = vpop.xlane.xlu0 %427 }
  0xfb   : > { %v429_v26 = vadd.f32 %v428_v25, %v411_v24 }
  0xfc   : > { %v434_v27 = vld [vmem:[#allocation2] sm:$0xf] }
  0xfd   : > { %435 = vst.msk [vmem:[%s284_s8] sm:$0xf] %vm296_vm0, %v434_v27 }
  0xfe   : > { %430 = vst.msk [vmem:[#allocation3] sm:$0xf] %vm296_vm0, %v429_v26 }
 0x105   : > { %v436_v28 = vld [vmem:[#allocation3] sm:$0xf] }
 0x106   : > { %437 = vst.msk [vmem:[%s291_s11] sm:$0xf] %vm296_vm0, %v436_v28 }
 0x107 PF: > { %s20_s17 = sadd.s32 1, %s795_s17   ;;  %s966_s12 = smov %s779_s13 }
 0x108   : > { %p17_p0 = scmp.ge.s32.totalorder %s20_s17, 4   ;;  %s967_s13 = smov %s783_s14 }
 0x109   : > { %s968_s14 = smov %s867_s24  ;;  %s969_s15 = smov %s791_s16 }
 0x10a   : > { %s970_s16 = smov %s972_s19  ;;  %19 = sbr.rel (!%p17_p0) target bundleno = 6 (0x6), region = 101 }
 0x10f   :  { %483 = vsyncpa [#allocation5], 1 }
 0x110   :  { %485 = vsyncpa [#allocation5 + $0x1], 1 }
 0x111   :  { %486 = vsyncpa [#allocation7], 1 }
 0x112   :  { %488 = vsyncpa [#allocation7 + $0x1], 1 }

</bundles_post_ra>
